<compile_context>
chip_gen: v7x
topology: tpu7x:2x2x1
jax: 0.10.0
libtpu: 0.0.40
codegen_flags: <defaults>
</compile_context>

<pallas_src>
import functools
import math

import jax
import jax.numpy as jnp
from jax import lax
from jax.experimental import pallas as pl
from jax.experimental.pallas import tpu as pltpu

# ---------------------------------------------------------------------------
# Model hyper-parameters (MatformerConfig defaults)
# ---------------------------------------------------------------------------
ATOM_F = 92          # atom_input_features
NODE_F = 128         # node_features / fc_features
EDGE_BINS = 128      # edge_features (RBF bins)
HEADS = 4            # node_layer_head
HEAD_C = 128         # out_channels per head (== node_features)
HC = HEADS * HEAD_C  # 512
C3 = 3 * HEAD_C      # 384
GLOB_F = 108         # GATGNN global (composition) feature width
CONV_LAYERS = 5
BN_EPS = 1e-5
LN_EPS = 1e-5


def _round_up(v, m):
    return ((v + m - 1) // m) * m


def _tile_rows(m, tm):
    """Largest row tile <= tm, but force >=2 grid steps when splittable so the
    'parallel' grid axis can shard across v7x's two TensorCores."""
    m16 = _round_up(max(m, 1), 16)
    tm_eff = min(tm, m16)
    if m16 > 16:
        half = _round_up((m16 + 1) // 2, 16)
        tm_eff = min(tm_eff, half)
    return tm_eff


def _pad_rows(x, mult):
    m = x.shape[0]
    pm = _round_up(m, mult)
    if pm != m:
        x = jnp.pad(x, ((0, pm - m), (0, 0)))
    return x, m


def _pad_cols(x, mult):
    n = x.shape[-1]
    pn = _round_up(n, mult)
    if pn != n:
        x = jnp.pad(x, ((0, 0), (0, pn - n)))
    return x


def _apply_act(y, act):
    if act == "softplus":       # PyTorch softplus (beta=1, threshold=20)
        return jnp.where(y > 20.0, y, jnp.log1p(jnp.exp(jnp.minimum(y, 20.0))))
    if act == "silu":
        return y * pl.reciprocal(1.0 + jnp.exp(-y), approx=True)
    if act == "sigmoid":
        return pl.reciprocal(1.0 + jnp.exp(-y), approx=True)
    return y


# ---------------------------------------------------------------------------
# Pallas kernel 1: fused   y = act((x @ W) * scale + shift) [+ residual]
#   * bias folded into shift; x arrives bf16; f32 accumulation.
#   * output width padded to a multiple of 128 (lane-dense stores).
# ---------------------------------------------------------------------------
def _linear_kernel(*refs, act, has_res):
    if has_res:
        x_ref, w_ref, s_ref, t_ref, r_ref, o_ref = refs
    else:
        x_ref, w_ref, s_ref, t_ref, o_ref = refs
    y = jnp.dot(x_ref[...], w_ref[...], preferred_element_type=jnp.float32)
    y = y * s_ref[...] + t_ref[...]
    y = _apply_act(y, act)
    if has_res:
        y = y + r_ref[...].astype(jnp.float32)
    o_ref[...] = y.astype(o_ref.dtype)


def linear_act(x, w, b=None, scale=None, shift=None, act="none",
               residual=None, out_dtype=jnp.float32, tm=512):
    """x:[M,K], w:[K,N] (already transposed from torch [N,K])."""
    M, K = x.shape
    Kw, N = w.shape
    assert K == Kw
    s = jnp.ones((N,), jnp.float32) if scale is None else scale
    t = jnp.zeros((N,), jnp.float32) if shift is None else shift
    if b is not None:
        t = b * s + t                       # fold bias into shift

    Np = max(128, _round_up(N, 128))        # lane-dense output width
    Kp = max(128, _round_up(K, 128))        # aligned contraction width
    wp = w.astype(jnp.bfloat16)
    if Np != N or Kp != K:
        wp = jnp.pad(wp, ((0, Kp - K), (0, Np - N)))
        s = jnp.pad(s, (0, Np - N))
        t = jnp.pad(t, (0, Np - N))
    xb = x.astype(jnp.bfloat16)
    if Kp != K:
        xb = _pad_cols(xb, 128)

    tm_eff = _tile_rows(M, tm)
    xp, m0 = _pad_rows(xb, tm_eff)
    Mp = xp.shape[0]

    in_specs = [
        pl.BlockSpec((tm_eff, Kp), lambda i: (i, 0)),
        pl.BlockSpec((Kp, Np), lambda i: (0, 0)),
        pl.BlockSpec((1, Np), lambda i: (0, 0)),
        pl.BlockSpec((1, Np), lambda i: (0, 0)),
    ]
    args = [xp, wp, s.reshape(1, Np), t.reshape(1, Np)]
    has_res = residual is not None
    if has_res:
        r = residual.astype(jnp.bfloat16)
        if r.shape[1] != Np:
            r = jnp.pad(r, ((0, 0), (0, Np - r.shape[1])))
        rp, _ = _pad_rows(r, tm_eff)
        in_specs.append(pl.BlockSpec((tm_eff, Np), lambda i: (i, 0)))
        args.append(rp)

    out = pl.pallas_call(
        functools.partial(_linear_kernel, act=act, has_res=has_res),
        out_shape=jax.ShapeDtypeStruct((Mp, Np), out_dtype),
        grid_spec=pltpu.PrefetchScalarGridSpec(
            num_scalar_prefetch=0,
            grid=(Mp // tm_eff,),
            in_specs=in_specs,
            out_specs=pl.BlockSpec((tm_eff, Np), lambda i: (i, 0)),
        ),
        compiler_params=pltpu.CompilerParams(dimension_semantics=("parallel",)),
    )(*args)
    return out[:m0, :N]


# ---------------------------------------------------------------------------
# Pallas kernel 2: fused RBF expansion + 2-layer MLP (Linear/Softplus/Linear).
# ---------------------------------------------------------------------------
def _rbf_mlp_kernel(d_ref, c_ref, w1_ref, b1_ref, w2_ref, b2_ref, o_ref, *, gamma):
    d = d_ref[...]                                   # [tm,1] f32
    diff = d - c_ref[...]                            # [tm,128]
    r = jnp.exp(-gamma * diff * diff)
    y = jnp.dot(r.astype(jnp.bfloat16), w1_ref[...], preferred_element_type=jnp.float32)
    y = _apply_act(y + b1_ref[...], "softplus")
    y = jnp.dot(y.astype(jnp.bfloat16), w2_ref[...], preferred_element_type=jnp.float32)
    y = y + b2_ref[...]
    o_ref[...] = y.astype(o_ref.dtype)


def rbf_edge_mlp(dlen, centers, w1, b1, w2, b2, gamma,
                 out_dtype=jnp.bfloat16, tm=512):
    E = dlen.shape[0]
    tm_eff = _tile_rows(E, tm)
    d2, m0 = _pad_rows(dlen.reshape(E, 1).astype(jnp.float32), tm_eff)
    Mp = d2.shape[0]
    out = pl.pallas_call(
        functools.partial(_rbf_mlp_kernel, gamma=gamma),
        out_shape=jax.ShapeDtypeStruct((Mp, NODE_F), out_dtype),
        grid_spec=pltpu.PrefetchScalarGridSpec(
            num_scalar_prefetch=0,
            grid=(Mp // tm_eff,),
            in_specs=[
                pl.BlockSpec((tm_eff, 1), lambda i: (i, 0)),
                pl.BlockSpec((1, EDGE_BINS), lambda i: (0, 0)),
                pl.BlockSpec((EDGE_BINS, NODE_F), lambda i: (0, 0)),
                pl.BlockSpec((1, NODE_F), lambda i: (0, 0)),
                pl.BlockSpec((NODE_F, NODE_F), lambda i: (0, 0)),
                pl.BlockSpec((1, NODE_F), lambda i: (0, 0)),
            ],
            out_specs=pl.BlockSpec((tm_eff, NODE_F), lambda i: (i, 0)),
        ),
        compiler_params=pltpu.CompilerParams(dimension_semantics=("parallel",)),
    )(d2, centers.reshape(1, EDGE_BINS),
      w1.astype(jnp.bfloat16), b1.reshape(1, NODE_F),
      w2.astype(jnp.bfloat16), b2.reshape(1, NODE_F))
    return out[:m0]


# ---------------------------------------------------------------------------
# Pallas kernel 3: fused GATGNN global-attention 3-layer MLP.
# concat(node, glob) avoided by splitting the first-layer weight.
# ---------------------------------------------------------------------------
def _glob_mlp_kernel(h_ref, g_ref, w0h_ref, w0g_ref, b0_ref,
                     w1_ref, b1_ref, w2_ref, b2_ref, o_ref):
    y = (jnp.dot(h_ref[...], w0h_ref[...], preferred_element_type=jnp.float32)
         + jnp.dot(g_ref[...], w0g_ref[...], preferred_element_type=jnp.float32)
         + b0_ref[...])
    y = _apply_act(y, "softplus")
    y = jnp.dot(y.astype(jnp.bfloat16), w1_ref[...],
                preferred_element_type=jnp.float32) + b1_ref[...]
    y = _apply_act(y, "softplus")
    y = jnp.dot(y.astype(jnp.bfloat16), w2_ref[...],
                preferred_element_type=jnp.float32) + b2_ref[...]
    o_ref[...] = y


def global_att_mlp(h, glob, w0h, w0g, b0, w1, b1, w2, b2, tm=512):
    N = h.shape[0]
    tm_eff = _tile_rows(N, tm)
    hb, m0 = _pad_rows(h.astype(jnp.bfloat16), tm_eff)
    gb = _pad_cols(glob.astype(jnp.bfloat16), 128)          # K=108 -> 128
    gb, _ = _pad_rows(gb, tm_eff)
    Gp = gb.shape[1]
    Mp = hb.shape[0]
    w0g_p = jnp.pad(w0g.astype(jnp.bfloat16), ((0, Gp - w0g.shape[0]), (0, 0)))
    w2_p = jnp.pad(w2.astype(jnp.bfloat16), ((0, 0), (0, NODE_F - w2.shape[1])))
    b2_p = jnp.pad(b2, (0, NODE_F - b2.shape[0]))

    out = pl.pallas_call(
        _glob_mlp_kernel,
        out_shape=jax.ShapeDtypeStruct((Mp, NODE_F), jnp.float32),
        grid_spec=pltpu.PrefetchScalarGridSpec(
            num_scalar_prefetch=0,
            grid=(Mp // tm_eff,),
            in_specs=[
                pl.BlockSpec((tm_eff, NODE_F), lambda i: (i, 0)),
                pl.BlockSpec((tm_eff, Gp), lambda i: (i, 0)),
                pl.BlockSpec((NODE_F, NODE_F), lambda i: (0, 0)),
                pl.BlockSpec((Gp, NODE_F), lambda i: (0, 0)),
                pl.BlockSpec((1, NODE_F), lambda i: (0, 0)),
                pl.BlockSpec((NODE_F, NODE_F), lambda i: (0, 0)),
                pl.BlockSpec((1, NODE_F), lambda i: (0, 0)),
                pl.BlockSpec((NODE_F, NODE_F), lambda i: (0, 0)),
                pl.BlockSpec((1, NODE_F), lambda i: (0, 0)),
            ],
            out_specs=pl.BlockSpec((tm_eff, NODE_F), lambda i: (i, 0)),
        ),
        compiler_params=pltpu.CompilerParams(dimension_semantics=("parallel",)),
    )(hb, gb, w0h.astype(jnp.bfloat16), w0g_p, b0.reshape(1, NODE_F),
      w1.astype(jnp.bfloat16), b1.reshape(1, NODE_F), w2_p,
      b2_p.reshape(1, NODE_F))
    return out[:m0, :1]


# ---------------------------------------------------------------------------
# Pallas kernel 4: fused MatformerConv per-(edge, head) message.
#   alpha = [q|q|q] * [k_i|k_j|e]            (1/sqrt(3C) folded into q weights)
#   gate  = sigmoid(LayerNorm_3C(alpha))
#   m     = LayerNorm_C( (([v_i|v_j|e] @ W_upd + b_upd) * gate) @ W_msg + b_msg )
# Chunk-wise (three 128-wide chunks, partial-K dots); alpha is recomputed per
# chunk instead of kept live across the LN statistics pass.
# ---------------------------------------------------------------------------
def _edge_msg_kernel(q_ref, ki_ref, kj_ref, vi_ref, vj_ref, e_ref,
                     wu_ref, bu_ref, lw1_ref, lb1_ref,
                     wm_ref, bm_ref, lw2_ref, lb2_ref, o_ref):
    C = HEAD_C
    q = q_ref[...].astype(jnp.float32)

    def alpha_chunk(c):
        kc = (ki_ref, kj_ref, e_ref)[c][...].astype(jnp.float32)
        return q * kc

    # LayerNorm statistics over the (virtual) 3C axis, chunk-accumulated
    inv_n = 1.0 / C3
    ssum = jnp.zeros((q.shape[0], 1), jnp.float32)
    ssq = jnp.zeros((q.shape[0], 1), jnp.float32)
    for c in range(3):
        a = alpha_chunk(c)
        ssum = ssum + a.sum(axis=-1, keepdims=True)
        ssq = ssq + (a * a).sum(axis=-1, keepdims=True)
    mean = ssum * inv_n
    rstd = lax.rsqrt(jnp.maximum(ssq * inv_n - mean * mean, 0.0) + LN_EPS)

    vi = vi_ref[...]                       # bf16
    vj = vj_ref[...]
    eb = e_ref[...]
    lw1 = lw1_ref[...]
    lb1 = lb1_ref[...]
    bu = bu_ref[...]

    acc = jnp.zeros(o_ref.shape, jnp.float32)
    for c in range(3):                     # unrolled, static 128-wide chunks
        lo, hi = c * C, (c + 1) * C
        a = alpha_chunk(c)
        z = (a - mean) * rstd * lw1[:, lo:hi] + lb1[:, lo:hi]
        gate = pl.reciprocal(1.0 + jnp.exp(-z), approx=True)
        upd = (jnp.dot(vi, wu_ref[0:C, lo:hi], preferred_element_type=jnp.float32)
               + jnp.dot(vj, wu_ref[C:2 * C, lo:hi], preferred_element_type=jnp.float32)
               + jnp.dot(eb, wu_ref[2 * C:3 * C, lo:hi], preferred_element_type=jnp.float32)
               + bu[:, lo:hi])
        acc = acc + jnp.dot((upd * gate).astype(jnp.bfloat16), wm_ref[lo:hi, :],
                            preferred_element_type=jnp.float32)

    m = acc + bm_ref[...]
    mu = jnp.mean(m, axis=-1, keepdims=True)
    var = jnp.mean(jnp.square(m - mu), axis=-1, keepdims=True)
    o_ref[...] = (m - mu) * lax.rsqrt(var + LN_EPS) * lw2_ref[...] + lb2_ref[...]


def edge_message(q, ki, kj, vi, vj, e,
                 w_upd, b_upd, ln1_w, ln1_b,
                 w_msg, b_msg, ln2_w, ln2_b, tm=512):
    EH, C = q.shape
    tm_eff = _tile_rows(EH, tm)
    rows = []
    m0 = EH
    for r in (q, ki, kj, vi, vj, e):
        rp, m0 = _pad_rows(r.astype(jnp.bfloat16), tm_eff)
        rows.append(rp)
    Mp = rows[0].shape[0]
    row_spec = pl.BlockSpec((tm_eff, C), lambda i: (i, 0))
    full = lambda shape: pl.BlockSpec(shape, lambda i: (0, 0))

    out = pl.pallas_call(
        _edge_msg_kernel,
        out_shape=jax.ShapeDtypeStruct((Mp, C), jnp.float32),
        grid_spec=pltpu.PrefetchScalarGridSpec(
            num_scalar_prefetch=0,
            grid=(Mp // tm_eff,),
            in_specs=[row_spec] * 6 + [
                full((C3, C3)), full((1, C3)), full((1, C3)), full((1, C3)),
                full((C3, C)), full((1, C)), full((1, C)), full((1, C)),
            ],
            out_specs=pl.BlockSpec((tm_eff, C), lambda i: (i, 0)),
        ),
        compiler_params=pltpu.CompilerParams(dimension_semantics=("parallel",)),
    )(*rows,
      w_upd.astype(jnp.bfloat16), b_upd.reshape(1, C3),
      ln1_w.reshape(1, C3), ln1_b.reshape(1, C3),
      w_msg.astype(jnp.bfloat16), b_msg.reshape(1, C),
      ln2_w.reshape(1, C), ln2_b.reshape(1, C))
    return out[:m0]


# ---------------------------------------------------------------------------
# Parameters (deterministic synthetic init; torch Linear weights stored
# transposed as [in, out]; matmul weights stored bf16, epilogue params f32).
# q/k/v/lin_skip fused into one [128, 1664] weight per layer (q pre-scaled by
# 1/sqrt(3C)); all 5 layers' lin_edge fused into one [128, 2560] weight.
# ---------------------------------------------------------------------------
def init_params(key):
    keys = iter(jax.random.split(key, 256))
    nk = lambda: next(keys)
    d = lambda shape, s=0.05: s * jax.random.normal(nk(), shape, dtype=jnp.float32)
    bf = lambda a: a.astype(jnp.bfloat16)
    inv_sqrt = 1.0 / math.sqrt(3.0 * HEAD_C)

    p = {
        "atom_w": bf(d((ATOM_F, NODE_F))), "atom_b": d((NODE_F,)),
        "rbf_w1": bf(d((EDGE_BINS, NODE_F))), "rbf_b1": d((NODE_F,)),
        "rbf_w2": bf(d((NODE_F, NODE_F))), "rbf_b2": d((NODE_F,)),
        "g_w0h": bf(d((NODE_F, NODE_F))), "g_w0g": bf(d((GLOB_F, NODE_F))),
        "g_b0": d((NODE_F,)),
        "g_w1": bf(d((NODE_F, NODE_F))), "g_b1": d((NODE_F,)),
        "g_w2": bf(d((NODE_F, 1))), "g_b2": d((1,)),
        "out_w": bf(d((NODE_F, 1))), "out_b": d((1,)),
    }
    layers = []
    we_all = []
    bn_scale = jnp.full((NODE_F,), 1.0 / math.sqrt(1.0 + BN_EPS), jnp.float32)
    for _ in range(CONV_LAYERS):
        wq, wk, wv = d((NODE_F, HC)), d((NODE_F, HC)), d((NODE_F, HC))
        w_skip = d((NODE_F, NODE_F))
        bq, bk, bv, b_skip = d((HC,)), d((HC,)), d((HC,)), d((NODE_F,))
        wq = wq * inv_sqrt                    # fold attention scale into q
        bq = bq * inv_sqrt
        layers.append(dict(
            w_qkvs=bf(jnp.concatenate([wq, wk, wv, w_skip], axis=1)),   # [128,1664]
            b_qkvs=jnp.concatenate([bq, bk, bv, b_skip]),               # [1664]
            w_upd=bf(d((C3, C3))), b_upd=d((C3,)),
            ln1_w=jnp.ones((C3,), jnp.float32), ln1_b=jnp.zeros((C3,), jnp.float32),
            w_msg=bf(d((C3, HEAD_C))), b_msg=d((HEAD_C,)),
            ln2_w=jnp.ones((HEAD_C,), jnp.float32), ln2_b=jnp.zeros((HEAD_C,), jnp.float32),
            w_cat=bf(d((HC, NODE_F))), b_cat=d((NODE_F,)),
            bn_scale=bn_scale, bn_shift=jnp.zeros((NODE_F,), jnp.float32),
        ))
        we_all.append(d((NODE_F, HC)))                                  # lin_edge (bias=False)
    p["att"] = layers
    p["we_all"] = bf(jnp.concatenate(we_all, axis=1))                   # [128, 2560]
    return p


# ---------------------------------------------------------------------------
# Forward pass
# ---------------------------------------------------------------------------
def matformer_forward(p, x, edge_attr, edge_index, batch, glob_feat, num_graphs):
    N = x.shape[0]
    E = edge_index.shape[1]
    src = edge_index[0]
    dst = edge_index[1]

    # atom embedding (K=92 zero-padded to 128 inside linear_act)
    h = linear_act(x, p["atom_w"], p["atom_b"])                         # [N,128] f32

    # RBF expansion of edge lengths (vmin=0, vmax=8, bins=128) + 2-layer MLP,
    # fused in a single kernel (raw RBF features never touch HBM)
    dlen = jnp.sqrt(jnp.sum(edge_attr * edge_attr, axis=1))             # torch.norm(dim=1)
    centers = jnp.linspace(0.0, 8.0, EDGE_BINS)
    gamma = (EDGE_BINS - 1) / 8.0                                       # 1/mean(diff(centers))
    ef = rbf_edge_mlp(dlen, centers, p["rbf_w1"], p["rbf_b1"],
                      p["rbf_w2"], p["rbf_b2"], gamma)                  # [E,128] bf16

    # all 5 layers' lin_edge projections in one pass over ef
    eemb_all = linear_act(ef, p["we_all"], out_dtype=jnp.bfloat16)      # [E,2560] bf16

    # 5 MatformerConv layers
    for li, L in enumerate(p["att"]):
        # fused q | k | v | lin_skip projection: one MXU pass over h, bf16 out
        qkvs = linear_act(h, L["w_qkvs"], L["b_qkvs"],
                          out_dtype=jnp.bfloat16)                       # [N,1664] bf16
        q, k, v = qkvs[:, :HC], qkvs[:, HC:2 * HC], qkvs[:, 2 * HC:3 * HC]
        skip = qkvs[:, 3 * HC:3 * HC + NODE_F]
        eemb = eemb_all[:, li * HC:(li + 1) * HC]                       # [E,512] bf16

        # TODO(synk): per-edge src/dst gathers are data-dependent; kept as XLA
        # gathers (now bf16, half the bytes). In-kernel fusion needs per-edge
        # manual DMA from HBM with scalar-prefetched indices.
        q_i = q[dst].reshape(E * HEADS, HEAD_C)
        k_i = k[dst].reshape(E * HEADS, HEAD_C)
        k_j = k[src].reshape(E * HEADS, HEAD_C)
        v_i = v[dst].reshape(E * HEADS, HEAD_C)
        v_j = v[src].reshape(E * HEADS, HEAD_C)
        e_h = eemb.reshape(E * HEADS, HEAD_C)

        m = edge_message(q_i, k_i, k_j, v_i, v_j, e_h,
                         L["w_upd"], L["b_upd"], L["ln1_w"], L["ln1_b"],
                         L["w_msg"], L["b_msg"], L["ln2_w"], L["ln2_b"])  # [E*H,128] f32

        # TODO(synk): data-dependent scatter-add stays in XLA (segment_sum);
        # fusing it needs dst-sorted edges + scalar-prefetched segment offsets.
        agg = jax.ops.segment_sum(m.reshape(E, HC), dst, num_segments=N)  # [N,512]

        # lin_concate + BN(eval, identity stats) + SiLU + residual, one kernel
        h = linear_act(agg, L["w_cat"], L["b_cat"],
                       scale=L["bn_scale"], shift=L["bn_shift"],
                       act="silu", residual=skip)                         # [N,128] f32

    # GATGNN global attention: 3-layer MLP fused; node/global concat avoided
    a = global_att_mlp(h, glob_feat, p["g_w0h"], p["g_w0g"], p["g_b0"],
                       p["g_w1"], p["g_b1"], p["g_w2"], p["g_b2"])        # [N,1]

    # TODO(synk): per-graph segment softmax (torch_geometric softmax) stays in JAX.
    s = a[:, 0]
    smax = jax.ops.segment_max(s, batch, num_segments=num_graphs)
    ex = jnp.exp(s - smax[batch])
    den = jax.ops.segment_sum(ex, batch, num_segments=num_graphs)
    out_a = (ex / den[batch])[:, None]                                    # [N,1]

    out_x = h * out_a                                                     # [N,128]
    pooled = jax.ops.segment_sum(out_x, batch, num_segments=num_graphs)   # [G,128]
    out = linear_act(pooled, p["out_w"], p["out_b"])                      # [G,1]
    return out.reshape(-1)                                                # [G]


# ---------------------------------------------------------------------------
if __name__ == "__main__":
    key = jax.random.PRNGKey(0)
    kp, kx, ke, kg, k1, k2, k3, k4 = jax.random.split(key, 8)
    params = init_params(kp)

    N, E, G = 8, 16, 2
    x = jax.random.normal(kx, (N, ATOM_F), dtype=jnp.float32)
    edge_attr = 2.0 * jax.random.normal(ke, (E, 3), dtype=jnp.float32)
    # edges kept inside each graph (nodes 0-3 -> graph 0, nodes 4-7 -> graph 1)
    src = jnp.concatenate([jax.random.randint(k1, (E // 2,), 0, N // 2),
                           jax.random.randint(k3, (E // 2,), N // 2, N)]).astype(jnp.int32)
    dst = jnp.concatenate([jax.random.randint(k2, (E // 2,), 0, N // 2),
                           jax.random.randint(k4, (E // 2,), N // 2, N)]).astype(jnp.int32)
    edge_index = jnp.stack([src, dst])
    batch = jnp.concatenate([jnp.zeros((N // 2,), jnp.int32),
                             jnp.ones((N // 2,), jnp.int32)])
    glob_feat = jax.random.uniform(kg, (N, GLOB_F), dtype=jnp.float32)

    out = matformer_forward(params, x, edge_attr, edge_index, batch, glob_feat, G)
    out = jax.block_until_ready(out)
    assert out.shape == (G,) and jnp.all(jnp.isfinite(out))
    print("KERNEL_OK")
</pallas_src>

<mosaic_0001>
module attributes {stable_mosaic.version = 11 : i64} {
  func.func @_linear_kernel(%arg0: i32, %arg1: memref<16x128xbf16, #tpu.memory_space<vmem>>, %arg2: memref<128x128xbf16, #tpu.memory_space<vmem>>, %arg3: memref<1x128xf32, #tpu.memory_space<vmem>>, %arg4: memref<1x128xf32, #tpu.memory_space<vmem>>, %arg5: memref<16x128xf32, #tpu.memory_space<vmem>>) attributes {dimension_semantics = [#tpu.dimension_semantics<parallel>], iteration_bounds = array<i64: 1>, scalar_prefetch = 0 : i64, scratch_operands = 0 : i64, tpu.core_type = #tpu.core_type<tc>, window_params = [{transform_indices = @transform_0, window_bounds = array<i64: 16, 128>}, {pipeline_mode = #tpu.pipeline_mode<synchronous>, transform_indices = @transform_1, window_bounds = array<i64: 128, 128>}, {pipeline_mode = #tpu.pipeline_mode<synchronous>, transform_indices = @transform_2, window_bounds = array<i64: 1, 128>}, {pipeline_mode = #tpu.pipeline_mode<synchronous>, transform_indices = @transform_3, window_bounds = array<i64: 1, 128>}, {transform_indices = @transform_4, window_bounds = array<i64: 16, 128>}]} {
    %c0 = arith.constant 0 : index
    %c0_0 = arith.constant 0 : index
    %0 = vector.load %arg1[%c0, %c0_0] : memref<16x128xbf16, #tpu.memory_space<vmem>>, vector<16x128xbf16>
    %c0_1 = arith.constant 0 : index
    %c0_2 = arith.constant 0 : index
    %1 = vector.load %arg2[%c0_1, %c0_2] : memref<128x128xbf16, #tpu.memory_space<vmem>>, vector<128x128xbf16>
    %cst = arith.constant dense<0.000000e+00> : vector<16x128xf32>
    %2 = tpu.matmul %0, %1, %cst {dimension_numbers = #tpu.dot_dimension_numbers<[1], [0], [0], [1], [0, 0, 1, 1], [], []>} : vector<16x128xbf16>, vector<128x128xbf16>, vector<16x128xf32> -> vector<16x128xf32>
    %c0_3 = arith.constant 0 : index
    %c0_4 = arith.constant 0 : index
    %3 = vector.load %arg3[%c0_3, %c0_4] : memref<1x128xf32, #tpu.memory_space<vmem>>, vector<1x128xf32>
    %4 = vector.broadcast %3 : vector<1x128xf32> to vector<16x128xf32>
    %5 = arith.mulf %2, %4 : vector<16x128xf32>
    %c0_5 = arith.constant 0 : index
    %c0_6 = arith.constant 0 : index
    %6 = vector.load %arg4[%c0_5, %c0_6] : memref<1x128xf32, #tpu.memory_space<vmem>>, vector<1x128xf32>
    %7 = vector.broadcast %6 : vector<1x128xf32> to vector<16x128xf32>
    %8 = arith.addf %5, %7 : vector<16x128xf32>
    %c0_7 = arith.constant 0 : index
    %c0_8 = arith.constant 0 : index
    %9 = vector.load %arg5[%c0_7, %c0_8] : memref<16x128xf32, #tpu.memory_space<vmem>>, vector<16x128xf32>
    tpu.vector_store %arg5[%c0_7, %c0_8], %8 {strides = array<i32>} : memref<16x128xf32, #tpu.memory_space<vmem>>, vector<16x128xf32>,
    return
  }
  func.func @transform_0(%arg0: i32) -> (i32, i32) {
    %c0_i32 = arith.constant 0 : i32
    %c0_i32_0 = arith.constant 0 : i32
    return %arg0, %c0_i32 : i32, i32
  }
  func.func @transform_1(%arg0: i32) -> (i32, i32) {
    %c0_i32 = arith.constant 0 : i32
    %c0_i32_0 = arith.constant 0 : i32
    %c0_i32_1 = arith.constant 0 : i32
    return %c0_i32, %c0_i32_0 : i32, i32
  }
  func.func @transform_2(%arg0: i32) -> (i32, i32) {
    %c0_i32 = arith.constant 0 : i32
    %c0_i32_0 = arith.constant 0 : i32
    %c0_i32_1 = arith.constant 0 : i32
    return %c0_i32, %c0_i32_0 : i32, i32
  }
  func.func @transform_3(%arg0: i32) -> (i32, i32) {
    %c0_i32 = arith.constant 0 : i32
    %c0_i32_0 = arith.constant 0 : i32
    %c0_i32_1 = arith.constant 0 : i32
    return %c0_i32, %c0_i32_0 : i32, i32
  }
  func.func @transform_4(%arg0: i32) -> (i32, i32) {
    %c0_i32 = arith.constant 0 : i32
    %c0_i32_0 = arith.constant 0 : i32
    return %arg0, %c0_i32 : i32, i32
  }
}

</mosaic_0001>

<bundles_post_ra>
// kernel: tpu_custom_call.1
= control target key start
LH: loop header
LB: loop body
LE: loop exit
PB: predicated region body
PF: predicated region fallthrough
CT: control target
= control target key end

     0   :  { %9 = vsyncpa [#allocation3], 0  ;;  %s404_s0 = inlined_call_operand.hbm [shape: bf16[16,128], index: 0, kind: input, shape index: {}]   ;;  %s405_s1 = inlined_call_operand.hbm [shape: bf16[128,128], index: 1, kind: input, shape index: {}]   ;;  %s406_s2 = inlined_call_operand.vmem [shape: f32[1,128], index: 2, kind: input, shape index: {}]   ;;  %s407_s3 = inlined_call_operand.vmem [shape: f32[1,128], index: 3, kind: input, shape index: {}]   ;;  %s408_s4 = inlined_call_operand.hbm [shape: f32[16,128], index: 4, kind: output, shape index: {}]  }
   0x1   :  { %10 = vsyncpa [#allocation6], 0 }
   0x2   :  { %11 = vsyncpa [#allocation4], 0  ;;  %s328_s15 = smov [#allocation2]   ;;  %s256_s19 = scalar_lea.hbm %s404_s0, 128 }
   0x3   :  { %s17_s16 = sshll.u32 %s328_s15, 4  ;;  %p257_p0 = scmp.ne.s32.totalorder %s404_s0, %s256_s19  ;;  %s18_s16 = int_to_ptr.vmem [resolvable:$true] %s17_s16 }
   0x4   :  { %p260_p1 = scmp.lt.u32.totalorder %s256_s19, %s404_s0 }
   0x6   :  { %p262_p2 = pnand %p260_p1, %p257_p0 }
   0x8   :  { %265 = shalt.err (!%p262_p2)
}
   0x9   :  { %s266_s24 = scalar_lea.vmem %s18_s16, 128  ;;  %p271_p4 = scmp.lt.s32.totalorder %s18_s16, %s18_s16 }
   0xa   :  { %p267_p3 = scmp.ne.s32.totalorder %s18_s16, %s266_s24  ;;  %p272_p5 = scmp.lt.s32.totalorder %s266_s24, %s266_s24 }
   0xc   :  { %p273_p6 = por %p272_p5, %p271_p4 }
   0xe   :  { %p274_p7 = pnand %p273_p6, %p267_p3 }
  0x10   :  { %277 = shalt.err (!%p274_p7)
}
  0x11   :  { %s329_s25 = smov 64   ;;  %s330_s26 = smov 4  }
  0x12   :  { %23 = dma.hbm_to_vmem [thread:$0]  %s404_s0, 128, %s18_s16, [#allocation3], %s329_s25, %s329_s25, %s330_s26  }
  0x13   :  { %s331_s29 = smov [#allocation5]   ;;  %s278_s7 = scalar_lea.hbm %s405_s1, 1024 }
  0x14   :  { %s29_s30 = sshll.u32 %s331_s29, 4  ;;  %p279_p8 = scmp.ne.s32.totalorder %s405_s1, %s278_s7  ;;  %s30_s30 = int_to_ptr.vmem [resolvable:$true] %s29_s30 }
  0x15   :  { %p282_p9 = scmp.lt.u32.totalorder %s278_s7, %s405_s1 }
  0x17   :  { %p284_p10 = pnand %p282_p9, %p279_p8 }
  0x19   :  { %287 = shalt.err (!%p284_p10)
}
  0x1a   :  { %s288_s12 = scalar_lea.vmem %s30_s30, 1024  ;;  %p293_p12 = scmp.lt.s32.totalorder %s30_s30, %s30_s30 }
  0x1b   :  { %p289_p11 = scmp.ne.s32.totalorder %s30_s30, %s288_s12  ;;  %p294_p13 = scmp.lt.s32.totalorder %s288_s12, %s288_s12 }
  0x1d   :  { %p295_p0 = por %p294_p13, %p293_p12 }
  0x1f   :  { %p296_p1 = pnand %p295_p0, %p289_p11 }
  0x21   :  { %299 = shalt.err (!%p296_p1)
}
  0x22   :  { %35 = dma.hbm_to_vmem [thread:$0]  %s405_s1, 1024, %s30_s30, [#allocation6], %s329_s25, %s329_s25, %s330_s26  }
  0x23   :  { %322 = dma.done.wait [#allocation3], 128  }
  0x24   :  { %323 = vsyncadd [#allocation3], 4294967168 }
  0x25   :  { %324 = dma.done.wait [#allocation6], 1024  }
  0x26   :  { %325 = vsyncadd [#allocation6], 4294966272  ;;  %v332_v0 = vmov 0.0   ;;  %vm333_vm0 = vmmov 0   ;;  %v247_v1 = vld [vmem:[#allocation5] sm:$0xff]   ;;  %v248_v2 = vld [vmem:[#allocation5 + $0x8] sm:$0xff]  }
  0x27   :  { %218 = vmatprep.subr.bf16.mxu0 %v332_v0  ;;  %234 = vmatprep.mubr.msk.bf16.mxu0 %vm333_vm0, %v332_v0  ;;  %v249_v3 = vld [vmem:[#allocation5 + $0x10] sm:$0xff]   ;;  %v250_v4 = vld [vmem:[#allocation5 + $0x18] sm:$0xff]   ;;  %v251_v5 = vld [vmem:[#allocation5 + $0x20] sm:$0xff]   ;;  %s334_s17 = smov [#allocation7]  }
  0x28   :  { %219 = vmatpush3.bf16.msra.mxu0 %v247_v1  ;;  %v252_v6 = vld [vmem:[#allocation5 + $0x28] sm:$0xff]   ;;  %v253_v7 = vld [vmem:[#allocation5 + $0x30] sm:$0xff]   ;;  %v254_v8 = vld [vmem:[#allocation5 + $0x38] sm:$0xff]   ;;  %s185_s18 = sshll.u32 %s334_s17, 4  ;;  %s186_s18 = int_to_ptr.vmem [resolvable:$true] %s185_s18 }
  0x29   :  { %220 = vmatprep.subr.bf16.mxu0 %v332_v0  ;;  %v255_v9 = vld [vmem:[#allocation2] sm:$0xff]   ;;  %s300_s19 = scalar_lea.vmem %s186_s18, 256  ;;  %p305_p3 = scmp.lt.s32.totalorder %s186_s18, %s186_s18 }
  0x2a   :  { %v207_v10 = vld [vmem:[%s406_s2] ss:$0 sm:$0xff]  ;;  %p301_p2 = scmp.ne.s32.totalorder %s186_s18, %s300_s19  ;;  %p306_p4 = scmp.lt.s32.totalorder %s300_s19, %s300_s19 }
  0x2b   :  { %v208_v12 = vld [vmem:[%s407_s3] ss:$0 sm:$0xff] }
  0x2c   :  { %221 = vmatpush3.bf16.msra.mxu0 %v248_v2  ;;  %p307_p5 = por %p306_p4, %p305_p3 }
  0x2d   :  { %222 = vmatprep.subr.bf16.mxu0 %v332_v0 }
  0x2e   :  { %p308_p6 = pnand %p307_p5, %p301_p2 }
  0x30   :  { %223 = vmatpush3.bf16.msra.mxu0 %v249_v3 }
  0x31   :  { %224 = vmatprep.subr.bf16.mxu0 %v332_v0 }
  0x34   :  { %225 = vmatpush3.bf16.msra.mxu0 %v250_v4 }
  0x35   :  { %226 = vmatprep.subr.bf16.mxu0 %v332_v0 }
  0x38   :  { %227 = vmatpush3.bf16.msra.mxu0 %v251_v5 }
  0x39   :  { %228 = vmatprep.subr.bf16.mxu0 %v332_v0 }
  0x3c   :  { %229 = vmatpush3.bf16.msra.mxu0 %v252_v6 }
  0x3d   :  { %230 = vmatprep.subr.bf16.mxu0 %v332_v0 }
  0x40   :  { %231 = vmatpush3.bf16.msra.mxu0 %v253_v7 }
  0x41   :  { %232 = vmatprep.subr.bf16.mxu0 %v332_v0 }
  0x44   :  { %233 = vmatpush3.bf16.msra.mxu0 %v254_v8 }
  0x47   :  { %235 = vmatmul.mubr.bf16.vlgmr.msra.gmra.mrb[0].mxu0 %v255_v9 }
 0x11a   :  { %v153_v11 = vpop.f32.mrb[0].mxu0 }
 0x11b   :  { %v167_v13 = vmul.f32 %v207_v10, %v153_v11  ;;  %v236_v14 = vpop.f32.mrb[1].mxu0 }
 0x11c   :  { %v156_v15 = vpop.f32.mrb[2].mxu0 }
 0x11d   :  { %v176_v16 = vadd.f32 %v208_v12, %v167_v13  ;;  %v168_v17 = vmul.f32 %v207_v10, %v156_v15  ;;  %v237_v18 = vpop.f32.mrb[3].mxu0 }
 0x11f   :  { %178 = vst [vmem:[#allocation7] sm:$0xff] %v176_v16  ;;  %v177_v19 = vadd.f32 %v208_v12, %v168_v17 }
 0x121   :  { %179 = vst [vmem:[#allocation7 + $0x8] sm:$0xff] %v177_v19 }
 0x122   :  { %311 = shalt.err (!%p308_p6)
}
 0x123   :  { %s312_s20 = scalar_lea.hbm %s408_s4, 256 }
 0x124   :  { %p313_p7 = scmp.ne.s32.totalorder %s408_s4, %s312_s20  ;;  %p316_p8 = scmp.lt.u32.totalorder %s312_s20, %s408_s4 }
 0x126   :  { %p318_p9 = pnand %p316_p8, %p313_p7 }
 0x128   :  { %321 = shalt.err (!%p318_p9)
}
 0x129   :  { %s335_s25 = smov 128   ;;  %s336_s26 = smov 8  }
 0x12a   :  { %191 = dma.vmem_to_hbm [thread:$0]  %s186_s18, 256, %s408_s4, [#allocation4], %s335_s25, %s335_s25, %s336_s26  }
 0x12b   :  { %326 = dma.done.wait [#allocation4], 256  }
 0x12c   :  { %327 = vsyncadd [#allocation4], 4294967040 }
 0x12d   :  { %195 = vsyncpa [#allocation3], 1 }
 0x12e   :  { %196 = vsyncpa [#allocation6], 1 }
 0x12f   :  { %197 = vsyncpa [#allocation4], 1 }

</bundles_post_ra>
